<compile_context>
chip_gen: v7x
topology: tpu7x:2x2x1
jax: 0.10.0
libtpu: 0.0.40
codegen_flags: <defaults>
</compile_context>

<pallas_src>
import jax
import jax.numpy as jnp
from jax import lax
from jax.experimental import pallas as pl
from jax.experimental.pallas import tpu as pltpu

LANE = 128            # lane width: pad weight output dims to this
SUBLANE = 8           # sublane width: pad the (transposed) output rows to this
TILE_B_MAX = 2048     # max rows per grid step (amortizes ~0.35 us/step overhead)
SINGLE_TILE_MAX = 256 # batches at or below this run as one full-batch tile


def _round_up(x, m):
    return ((x + m - 1) // m) * m


def _pad2(a, rows, cols):
    return jnp.pad(a, ((0, rows - a.shape[0]), (0, cols - a.shape[1])))


def mlp_kernel(x_ref, w1_ref, b1_ref, w2_ref, b2_ref, w3t_ref, b3t_ref, o_ref):
    # Layer 1: bf16 MXU matmul, f32 accumulate; bias + ReLU in f32 on the VPU.
    x = x_ref[...].astype(jnp.bfloat16)                              # (tile_b, d_in)
    h = jnp.dot(x, w1_ref[...], preferred_element_type=jnp.float32)  # (tile_b, h1_p)
    h = jnp.maximum(h + b1_ref[...], 0.0)
    # Layer 2
    h = jnp.dot(h.astype(jnp.bfloat16), w2_ref[...],
                preferred_element_type=jnp.float32)                  # (tile_b, h2_p)
    h = jnp.maximum(h + b2_ref[...], 0.0)
    # Output layer, transposed so the batch lands on the lane axis:
    # (d_out_p, h2_p) . (tile_b, h2_p)^T -> (d_out_p, tile_b)
    o = lax.dot_general(w3t_ref[...], h.astype(jnp.bfloat16),
                        dimension_numbers=(((1,), (1,)), ((), ())),
                        preferred_element_type=jnp.float32)
    o_ref[...] = (o + b3t_ref[...]).astype(o_ref.dtype)


def mlp_forward(x, params):
    (w1, b1), (w2, b2), (w3, b3) = params
    B, d_in = x.shape
    h1 = w1.shape[1]
    h2 = w2.shape[1]
    d_out = w3.shape[1]

    h1_p = _round_up(h1, LANE)
    h2_p = _round_up(h2, LANE)
    d_out_p = _round_up(d_out, SUBLANE)

    # Batch tiling: one full-batch tile for small B (block dims == full array dims
    # are legal even when not 8/128-multiples); otherwise 128-multiple tiles with
    # >= 2 grid steps (v7x megacore) capped at TILE_B_MAX (v5e/v6e: fewer, bigger
    # steps toward the HBM roofline).
    if B <= SINGLE_TILE_MAX:
        tile_b = B
    else:
        tile_b = min(TILE_B_MAX, _round_up(pl.cdiv(B, 2), LANE))
    grid = (pl.cdiv(B, tile_b),)

    # Resident weights: bf16 + zero padding (tiny). Biases stay f32.
    w1_p = _pad2(w1, d_in, h1_p).astype(jnp.bfloat16)         # (d_in, 128)
    w2_p = _pad2(w2, h1_p, h2_p).astype(jnp.bfloat16)         # (128, 128)
    w3t_p = _pad2(w3.T, d_out_p, h2_p).astype(jnp.bfloat16)   # (8, 128)
    b1_p = _pad2(b1, 1, h1_p)                                 # (1, 128) f32
    b2_p = _pad2(b2, 1, h2_p)                                 # (1, 128) f32
    b3t_p = _pad2(b3.T, d_out_p, 1)                           # (8, 1)   f32

    # Advisory cost estimate with the de-padded traffic.
    flops = 2 * B * (d_in * h1 + h1 * h2 + h2 * d_out)
    bytes_accessed = (x.size * 4
                      + (w1_p.size + w2_p.size + w3t_p.size) * 2
                      + (b1_p.size + b2_p.size + b3t_p.size) * 4
                      + d_out_p * B * 4)
    cost = pl.CostEstimate(flops=flops, transcendentals=0,
                           bytes_accessed=bytes_accessed)

    resident = lambda i: (0, 0)   # weights / biases: same block every grid step

    out_t = pl.pallas_call(
        mlp_kernel,
        out_shape=jax.ShapeDtypeStruct((d_out_p, B), jnp.float32),
        grid=grid,
        in_specs=[
            pl.BlockSpec((tile_b, d_in), lambda i: (i, 0)),   # x: unpadded, batch-tiled
            pl.BlockSpec((d_in, h1_p), resident),             # w1
            pl.BlockSpec((1, h1_p), resident),                # b1
            pl.BlockSpec((h1_p, h2_p), resident),             # w2
            pl.BlockSpec((1, h2_p), resident),                # b2
            pl.BlockSpec((d_out_p, h2_p), resident),          # w3^T
            pl.BlockSpec((d_out_p, 1), resident),             # b3^T
        ],
        out_specs=pl.BlockSpec((d_out_p, tile_b), lambda i: (0, i)),
        compiler_params=pltpu.CompilerParams(
            dimension_semantics=("parallel",),
            vmem_limit_bytes=32 * 1024 * 1024,
        ),
        cost_estimate=cost,
    )(x, w1_p, b1_p, w2_p, b2_p, w3t_p, b3t_p)

    # (d_out_p, B) -> (B, d_out): keep the real output row(s), transpose back.
    return out_t[:d_out, :].T


def init_params(key, input_dim, hidden_layers, output_dim):
    """Deterministic init mirroring nn.Linear shapes, stored as (in, out)."""
    dims = [input_dim] + list(hidden_layers) + [output_dim]
    params = []
    for i in range(len(dims) - 1):
        key, kw, kb = jax.random.split(key, 3)
        fan_in = dims[i]
        bound = 1.0 / jnp.sqrt(fan_in)
        w = jax.random.uniform(kw, (dims[i], dims[i + 1]),
                               minval=-bound, maxval=bound, dtype=jnp.float32)
        b = jax.random.uniform(kb, (1, dims[i + 1]),
                               minval=-bound, maxval=bound, dtype=jnp.float32)
        params.append((w, b))
    return params


def mlp_reference_f32(x, params):
    (w1, b1), (w2, b2), (w3, b3) = params
    h = jnp.maximum(x @ w1 + b1, 0.0)
    h = jnp.maximum(h @ w2 + b2, 0.0)
    return h @ w3 + b3


def mlp_reference_bf16(x, params):
    # Mirrors the kernel's quantization: bf16 inputs/weights/intermediate
    # activations, f32 accumulation and f32 bias/ReLU.
    (w1, b1), (w2, b2), (w3, b3) = params
    q = lambda a: a.astype(jnp.bfloat16).astype(jnp.float32)
    h = jnp.maximum(q(x) @ q(w1) + b1, 0.0)
    h = jnp.maximum(q(h) @ q(w2) + b2, 0.0)
    return q(h) @ q(w3) + b3


if __name__ == "__main__":
    # StandardScaler preprocessing / training loop are host-side and out of scope;
    # this exercises the forward pass of MLP(input_dim, output_dim, [32, 32]).
    input_dim = 16     # stand-in for X.shape[1] after StandardScaler
    output_dim = 1
    hidden_layers = [32, 32]
    batch = 8

    key = jax.random.PRNGKey(0)
    key, kx = jax.random.split(key)
    x = jax.random.normal(kx, (batch, input_dim), dtype=jnp.float32)

    params = init_params(key, input_dim, hidden_layers, output_dim)

    out = mlp_forward(x, params)
    out = jax.block_until_ready(out)
    assert out.shape == (batch, output_dim)

    # Exact-quantization reference (matches kernel's bf16 rounding).
    ref_q = mlp_reference_bf16(x, params)
    assert jnp.allclose(out, ref_q, atol=1e-3, rtol=1e-3), (out, ref_q)

    # Sanity check against the pure-f32 forward pass (bf16 quantization error only).
    ref_f32 = mlp_reference_f32(x, params)
    assert jnp.allclose(out, ref_f32, atol=5e-2, rtol=5e-2), (out, ref_f32)

    print("KERNEL_OK")
</pallas_src>

<mosaic_0001>
module attributes {stable_mosaic.version = 11 : i64} {
  func.func @mlp_kernel(%arg0: i32, %arg1: memref<8x16xf32, #tpu.memory_space<vmem>>, %arg2: memref<16x128xbf16, #tpu.memory_space<vmem>>, %arg3: memref<1x128xf32, #tpu.memory_space<vmem>>, %arg4: memref<128x128xbf16, #tpu.memory_space<vmem>>, %arg5: memref<1x128xf32, #tpu.memory_space<vmem>>, %arg6: memref<8x128xbf16, #tpu.memory_space<vmem>>, %arg7: memref<8x1xf32, #tpu.memory_space<vmem>>, %arg8: memref<8x8xf32, #tpu.memory_space<vmem>>) attributes {dimension_semantics = [#tpu.dimension_semantics<parallel>], iteration_bounds = array<i64: 1>, scalar_prefetch = 0 : i64, scratch_operands = 0 : i64, tpu.core_type = #tpu.core_type<tc>, window_params = [{transform_indices = @transform_0, window_bounds = array<i64: 8, 16>}, {pipeline_mode = #tpu.pipeline_mode<synchronous>, transform_indices = @transform_1, window_bounds = array<i64: 16, 128>}, {pipeline_mode = #tpu.pipeline_mode<synchronous>, transform_indices = @transform_2, window_bounds = array<i64: 1, 128>}, {pipeline_mode = #tpu.pipeline_mode<synchronous>, transform_indices = @transform_3, window_bounds = array<i64: 128, 128>}, {pipeline_mode = #tpu.pipeline_mode<synchronous>, transform_indices = @transform_4, window_bounds = array<i64: 1, 128>}, {pipeline_mode = #tpu.pipeline_mode<synchronous>, transform_indices = @transform_5, window_bounds = array<i64: 8, 128>}, {pipeline_mode = #tpu.pipeline_mode<synchronous>, transform_indices = @transform_6, window_bounds = array<i64: 8, 1>}, {transform_indices = @transform_7, window_bounds = array<i64: 8, 8>}]} {
    %c0 = arith.constant 0 : index
    %c0_0 = arith.constant 0 : index
    %0 = vector.load %arg1[%c0, %c0_0] : memref<8x16xf32, #tpu.memory_space<vmem>>, vector<8x16xf32>
    %1 = arith.truncf %0 : vector<8x16xf32> to vector<8x16xbf16>
    %c0_1 = arith.constant 0 : index
    %c0_2 = arith.constant 0 : index
    %2 = vector.load %arg2[%c0_1, %c0_2] : memref<16x128xbf16, #tpu.memory_space<vmem>>, vector<16x128xbf16>
    %cst = arith.constant dense<0.000000e+00> : vector<8x128xf32>
    %3 = tpu.matmul %1, %2, %cst {dimension_numbers = #tpu.dot_dimension_numbers<[1], [0], [0], [1], [0, 0, 1, 1], [], []>} : vector<8x16xbf16>, vector<16x128xbf16>, vector<8x128xf32> -> vector<8x128xf32>
    %c0_3 = arith.constant 0 : index
    %c0_4 = arith.constant 0 : index
    %4 = vector.load %arg3[%c0_3, %c0_4] : memref<1x128xf32, #tpu.memory_space<vmem>>, vector<1x128xf32>
    %5 = vector.broadcast %4 : vector<1x128xf32> to vector<8x128xf32>
    %6 = arith.addf %3, %5 : vector<8x128xf32>
    %cst_5 = arith.constant 0.000000e+00 : f32
    %7 = vector.broadcast %cst_5 : f32 to vector<8x128xf32>
    %8 = arith.maximumf %6, %7 : vector<8x128xf32>
    %9 = arith.truncf %8 : vector<8x128xf32> to vector<8x128xbf16>
    %c0_6 = arith.constant 0 : index
    %c0_7 = arith.constant 0 : index
    %10 = vector.load %arg4[%c0_6, %c0_7] : memref<128x128xbf16, #tpu.memory_space<vmem>>, vector<128x128xbf16>
    %cst_8 = arith.constant dense<0.000000e+00> : vector<8x128xf32>
    %11 = tpu.matmul %9, %10, %cst_8 {dimension_numbers = #tpu.dot_dimension_numbers<[1], [0], [0], [1], [0, 0, 1, 1], [], []>} : vector<8x128xbf16>, vector<128x128xbf16>, vector<8x128xf32> -> vector<8x128xf32>
    %c0_9 = arith.constant 0 : index
    %c0_10 = arith.constant 0 : index
    %12 = vector.load %arg5[%c0_9, %c0_10] : memref<1x128xf32, #tpu.memory_space<vmem>>, vector<1x128xf32>
    %13 = vector.broadcast %12 : vector<1x128xf32> to vector<8x128xf32>
    %14 = arith.addf %11, %13 : vector<8x128xf32>
    %cst_11 = arith.constant 0.000000e+00 : f32
    %15 = vector.broadcast %cst_11 : f32 to vector<8x128xf32>
    %16 = arith.maximumf %14, %15 : vector<8x128xf32>
    %c0_12 = arith.constant 0 : index
    %c0_13 = arith.constant 0 : index
    %17 = vector.load %arg6[%c0_12, %c0_13] : memref<8x128xbf16, #tpu.memory_space<vmem>>, vector<8x128xbf16>
    %18 = arith.truncf %16 : vector<8x128xf32> to vector<8x128xbf16>
    %cst_14 = arith.constant dense<0.000000e+00> : vector<8x8xf32>
    %19 = tpu.matmul %17, %18, %cst_14 {dimension_numbers = #tpu.dot_dimension_numbers<[1], [1], [0], [0], [0, 0, 1, 0], [], []>} : vector<8x128xbf16>, vector<8x128xbf16>, vector<8x8xf32> -> vector<8x8xf32>
    %c0_15 = arith.constant 0 : index
    %c0_16 = arith.constant 0 : index
    %20 = vector.load %arg7[%c0_15, %c0_16] : memref<8x1xf32, #tpu.memory_space<vmem>>, vector<8x1xf32>
    %21 = vector.broadcast %20 : vector<8x1xf32> to vector<8x8xf32>
    %22 = arith.addf %19, %21 : vector<8x8xf32>
    %c0_17 = arith.constant 0 : index
    %c0_18 = arith.constant 0 : index
    %23 = vector.load %arg8[%c0_17, %c0_18] : memref<8x8xf32, #tpu.memory_space<vmem>>, vector<8x8xf32>
    tpu.vector_store %arg8[%c0_17, %c0_18], %22 {strides = array<i32>} : memref<8x8xf32, #tpu.memory_space<vmem>>, vector<8x8xf32>,
    return
  }
  func.func @transform_0(%arg0: i32) -> (i32, i32) {
    %c0_i32 = arith.constant 0 : i32
    %c0_i32_0 = arith.constant 0 : i32
    return %arg0, %c0_i32 : i32, i32
  }
  func.func @transform_1(%arg0: i32) -> (i32, i32) {
    %c0_i32 = arith.constant 0 : i32
    %c0_i32_0 = arith.constant 0 : i32
    %c0_i32_1 = arith.constant 0 : i32
    return %c0_i32, %c0_i32_0 : i32, i32
  }
  func.func @transform_2(%arg0: i32) -> (i32, i32) {
    %c0_i32 = arith.constant 0 : i32
    %c0_i32_0 = arith.constant 0 : i32
    %c0_i32_1 = arith.constant 0 : i32
    return %c0_i32, %c0_i32_0 : i32, i32
  }
  func.func @transform_3(%arg0: i32) -> (i32, i32) {
    %c0_i32 = arith.constant 0 : i32
    %c0_i32_0 = arith.constant 0 : i32
    %c0_i32_1 = arith.constant 0 : i32
    return %c0_i32, %c0_i32_0 : i32, i32
  }
  func.func @transform_4(%arg0: i32) -> (i32, i32) {
    %c0_i32 = arith.constant 0 : i32
    %c0_i32_0 = arith.constant 0 : i32
    %c0_i32_1 = arith.constant 0 : i32
    return %c0_i32, %c0_i32_0 : i32, i32
  }
  func.func @transform_5(%arg0: i32) -> (i32, i32) {
    %c0_i32 = arith.constant 0 : i32
    %c0_i32_0 = arith.constant 0 : i32
    %c0_i32_1 = arith.constant 0 : i32
    return %c0_i32, %c0_i32_0 : i32, i32
  }
  func.func @transform_6(%arg0: i32) -> (i32, i32) {
    %c0_i32 = arith.constant 0 : i32
    %c0_i32_0 = arith.constant 0 : i32
    %c0_i32_1 = arith.constant 0 : i32
    return %c0_i32, %c0_i32_0 : i32, i32
  }
  func.func @transform_7(%arg0: i32) -> (i32, i32) {
    %c0_i32 = arith.constant 0 : i32
    %c0_i32_0 = arith.constant 0 : i32
    return %c0_i32, %arg0 : i32, i32
  }
}

</mosaic_0001>

<bundles_post_ra>
// kernel: tpu_custom_call.1
= control target key start
LH: loop header
LB: loop body
LE: loop exit
PB: predicated region body
PF: predicated region fallthrough
CT: control target
= control target key end

     0   :  { %12 = vsyncpa [#allocation3], 0  ;;  %s543_s0 = inlined_call_operand.vmem [shape: f32[8,16], index: 0, kind: input, shape index: {}]   ;;  %s544_s1 = inlined_call_operand.hbm [shape: bf16[16,128], index: 1, kind: input, shape index: {}]   ;;  %s545_s2 = inlined_call_operand.vmem [shape: f32[1,128], index: 2, kind: input, shape index: {}]   ;;  %s546_s3 = inlined_call_operand.hbm [shape: bf16[128,128], index: 3, kind: input, shape index: {}]   ;;  %s547_s4 = inlined_call_operand.vmem [shape: f32[1,128], index: 4, kind: input, shape index: {}]   ;;  %s548_s5 = inlined_call_operand.vmem [shape: bf16[8,128], index: 5, kind: input, shape index: {}]   ;;  %s549_s6 = inlined_call_operand.vmem [shape: f32[8,1], index: 6, kind: input, shape index: {}]   ;;  %s550_s7 = inlined_call_operand.hbm [shape: f32[8,8], index: 7, kind: output, shape index: {}]  }
   0x1   :  { %13 = vsyncpa [#allocation6], 0 }
   0x2   :  { %14 = vsyncpa [#allocation4], 0  ;;  %s444_s24 = smov [#allocation2]   ;;  %s372_s28 = scalar_lea.hbm %s544_s1, 128 }
   0x3   :  { %s22_s25 = sshll.u32 %s444_s24, 4  ;;  %p373_p0 = scmp.ne.s32.totalorder %s544_s1, %s372_s28  ;;  %s23_s25 = int_to_ptr.vmem [resolvable:$true] %s22_s25 }
   0x4   :  { %p376_p1 = scmp.lt.u32.totalorder %s372_s28, %s544_s1 }
   0x6   :  { %p378_p2 = pnand %p376_p1, %p373_p0 }
   0x8   :  { %381 = shalt.err (!%p378_p2)
}
   0x9   :  { %s382_s10 = scalar_lea.vmem %s23_s25, 128  ;;  %p387_p4 = scmp.lt.s32.totalorder %s23_s25, %s23_s25 }
   0xa   :  { %p383_p3 = scmp.ne.s32.totalorder %s23_s25, %s382_s10  ;;  %p388_p5 = scmp.lt.s32.totalorder %s382_s10, %s382_s10 }
   0xc   :  { %p389_p6 = por %p388_p5, %p387_p4 }
   0xe   :  { %p390_p7 = pnand %p389_p6, %p383_p3 }
  0x10   :  { %393 = shalt.err (!%p390_p7)
}
  0x11   :  { %s445_s11 = smov 64   ;;  %s446_s12 = smov 4  }
  0x12   :  { %28 = dma.hbm_to_vmem [thread:$0]  %s544_s1, 128, %s23_s25, [#allocation3], %s445_s11, %s445_s11, %s446_s12  }
  0x13   :  { %s447_s15 = smov [#allocation5]   ;;  %s394_s19 = scalar_lea.hbm %s546_s3, 1024 }
  0x14   :  { %s36_s16 = sshll.u32 %s447_s15, 4  ;;  %p395_p8 = scmp.ne.s32.totalorder %s546_s3, %s394_s19  ;;  %s37_s16 = int_to_ptr.vmem [resolvable:$true] %s36_s16 }
  0x15   :  { %p398_p9 = scmp.lt.u32.totalorder %s394_s19, %s546_s3 }
  0x17   :  { %p400_p10 = pnand %p398_p9, %p395_p8 }
  0x19   :  { %403 = shalt.err (!%p400_p10)
}
  0x1a   :  { %s404_s24 = scalar_lea.vmem %s37_s16, 1024  ;;  %p409_p12 = scmp.lt.s32.totalorder %s37_s16, %s37_s16 }
  0x1b   :  { %p405_p11 = scmp.ne.s32.totalorder %s37_s16, %s404_s24  ;;  %p410_p13 = scmp.lt.s32.totalorder %s404_s24, %s404_s24 }
  0x1d   :  { %p411_p0 = por %p410_p13, %p409_p12 }
  0x1f   :  { %p412_p1 = pnand %p411_p0, %p405_p11 }
  0x21   :  { %415 = shalt.err (!%p412_p1)
}
  0x22   :  { %42 = dma.hbm_to_vmem [thread:$0]  %s546_s3, 1024, %s37_s16, [#allocation6], %s445_s11, %s445_s11, %s446_s12  }
  0x23   :  { %438 = dma.done.wait [#allocation3], 128  }
  0x24   :  { %439 = vsyncadd [#allocation3], 4294967168 }
  0x25   :  { %440 = dma.done.wait [#allocation6], 1024  }
  0x26   :  { %441 = vsyncadd [#allocation6], 4294966272  ;;  %v448_v0 = vmov 0.0   ;;  %vm449_vm0 = vmmov 0   ;;  %v363_v1 = vld [vmem:[#allocation2] sm:$0xff]   ;;  %vm73_vm1 = vcmask 130048  }
  0x27   :  { %322 = vmatprep.subr.bf16.mxu0 %v448_v0  ;;  %324 = vmatprep.mubr.msk.bf16.mxu0 %vm449_vm0, %v448_v0  ;;  %v56_v2 = vld [vmem:[%s543_s0] sm:$0xff]  ;;  %v364_v4 = vld [vmem:[#allocation5] sm:$0xff]   ;;  %v365_v5 = vld [vmem:[#allocation5 + $0x8] sm:$0xff]   ;;  %v450_v21 = vmov 0   ;;  %vm279_vm2 = vcmask 64512  }
  0x28   :  { %328 = vmatprep.subr.bf16.mxu1 %v448_v0  ;;  %344 = vmatprep.mubr.msk.bf16.mxu1 %vm449_vm0, %v448_v0  ;;  %v57_v3 = vpack.c.bf16 %v56_v2, %v56_v2  ;;  %v366_v6 = vld [vmem:[#allocation5 + $0x10] sm:$0xff]   ;;  %v367_v7 = vld [vmem:[#allocation5 + $0x18] sm:$0xff]   ;;  %v368_v8 = vld [vmem:[#allocation5 + $0x20] sm:$0xff]  }
  0x29   :  { %323 = vmatpush3.bf16.msra.mxu0 %v363_v1  ;;  %329 = vmatpush3.bf16.msra.mxu1 %v364_v4  ;;  %v369_v9 = vld [vmem:[#allocation5 + $0x28] sm:$0xff]   ;;  %v370_v10 = vld [vmem:[#allocation5 + $0x30] sm:$0xff]   ;;  %v371_v11 = vld [vmem:[#allocation5 + $0x38] sm:$0xff]  }
  0x2a   :  { %348 = vmatprep.subr.bf16.mxu0 %v448_v0  ;;  %330 = vmatprep.subr.bf16.mxu1 %v448_v0  ;;  %v297_v12 = vld [vmem:[%s545_s2] ss:$0 sm:$0xff] }
  0x2b   :  { %v233_v20 = vld [vmem:[%s549_s6] sm:$0xff]  ;;  %362 = vset.pattern.permute.xlu0 %v450_v21  ;;  %s451_s6 = smov [#allocation7]  }
  0x2c   :  { %325 = vmatmul.mubr.msk.bf16.vlgmr.msra.gmra.mrb[0].mxu0 %vm73_vm1, %v57_v3  ;;  %236 = vperm.xlu0 %362, %v233_v20   ;;  %v300_v22 = vld [vmem:[%s547_s4] ss:$0 sm:$0xff]  ;;  %s287_s10 = sshll.u32 %s451_s6, 4  ;;  %s288_s10 = int_to_ptr.vmem [resolvable:$true] %s287_s10 }
  0x2d   :  { %350 = vmatprep.mubr.msk.bf16.mxu0 %vm449_vm0, %v448_v0  ;;  %331 = vmatpush3.bf16.msra.mxu1 %v365_v5  ;;  %v231_v30 = vld [vmem:[%s548_s5] sm:$0xf]  ;;  %s416_s4 = scalar_lea.vmem %s288_s10, 128  ;;  %p421_p3 = scmp.lt.s32.totalorder %s288_s10, %s288_s10 }
  0x2e   :  { %332 = vmatprep.subr.bf16.mxu1 %v448_v0  ;;  %p417_p2 = scmp.ne.s32.totalorder %s288_s10, %s416_s4  ;;  %p422_p4 = scmp.lt.s32.totalorder %s416_s4, %s416_s4 }
  0x30   :  { %p423_p5 = por %p422_p4, %p421_p3 }
  0x31   :  { %333 = vmatpush3.bf16.msra.mxu1 %v366_v6 }
  0x32   :  { %334 = vmatprep.subr.bf16.mxu1 %v448_v0  ;;  %p424_p6 = pnand %p423_p5, %p417_p2 }
  0x35   :  { %335 = vmatpush3.bf16.msra.mxu1 %v367_v7 }
  0x36   :  { %336 = vmatprep.subr.bf16.mxu1 %v448_v0 }
  0x39   :  { %337 = vmatpush3.bf16.msra.mxu1 %v368_v8 }
  0x3a   :  { %338 = vmatprep.subr.bf16.mxu1 %v448_v0 }
  0x3d   :  { %339 = vmatpush3.bf16.msra.mxu1 %v369_v9 }
  0x3e   :  { %340 = vmatprep.subr.bf16.mxu1 %v448_v0 }
  0x41   :  { %341 = vmatpush3.bf16.msra.mxu1 %v370_v10 }
  0x42   :  { %342 = vmatprep.subr.bf16.mxu1 %v448_v0 }
  0x45   :  { %343 = vmatpush3.bf16.msra.mxu1 %v371_v11 }
  0xab   :  { %v237_v31 = vpop.permute.xlu0 %236 }
  0xff   :  { %v111_v13 = vpop.f32.mrb[0].mxu0 }
 0x100   :  { %v112_v14 = vadd.f32 %v297_v12, %v111_v13  ;;  %v326_v15 = vpop.f32.mrb[1].mxu0 }
 0x101   :  { %v114_v16 = vpop.f32.mrb[2].mxu0 }
 0x102   :  { %v117_v17 = vmax.f32 %v112_v14, 0.0  ;;  %v327_v18 = vpop.f32.mrb[3].mxu0 }
 0x104   :  { %v118_v19 = vpack.c.bf16 %v117_v17, %v117_v17 }
 0x106   :  { %345 = vmatmul.mubr.bf16.vlgmr.msra.gmra.mrb[0].mxu1 %v118_v19 }
 0x1d9   :  { %v224_v23 = vpop.f32.mrb[0].mxu1 }
 0x1da   :  { %v225_v24 = vadd.f32 %v300_v22, %v224_v23  ;;  %v346_v25 = vpop.f32.mrb[1].mxu1 }
 0x1db   :  { %v227_v26 = vpop.f32.mrb[2].mxu1 }
 0x1dc   :  { %v230_v27 = vmax.f32 %v225_v24, 0.0  ;;  %v347_v28 = vpop.f32.mrb[3].mxu1 }
 0x1de   :  { %v232_v29 = vpack.c.bf16 %v230_v27, %v230_v27 }
 0x1e0   :  { %349 = vmatpush3.bf16.xpose.msra.mxu0 %v232_v29 }
 0x1e7   :  { %351 = vmatmul.mubr.bf16.vlgmr.msra.gmra.mrb[4].mxu0 %v231_v30 }
 0x2ba   :  { %v273_v32 = vpop.f32.mrb[4].mxu0 }
 0x2bb   :  { %v274_v33 = vadd.f32 %v273_v32, %v237_v31  ;;  %v352_v34 = vpop.f32.mrb[5].mxu0 }
 0x2bc   :  { %v276_v35 = vpop.f32.mrb[6].mxu0 }
 0x2bd   :  { %v353_v36 = vpop.f32.mrb[7].mxu0  ;;  %280 = vst.msk [vmem:[#allocation7] sm:$0xff] %vm279_vm2, %v274_v33 }
 0x2be   :  { %427 = shalt.err (!%p424_p6)
}
 0x2bf   :  { %s428_s12 = scalar_lea.hbm %s550_s7, 128 }
 0x2c0   :  { %p429_p7 = scmp.ne.s32.totalorder %s550_s7, %s428_s12  ;;  %p432_p8 = scmp.lt.u32.totalorder %s428_s12, %s550_s7 }
 0x2c2   :  { %p434_p9 = pnand %p432_p8, %p429_p7 }
 0x2c4   :  { %437 = shalt.err (!%p434_p9)
}
 0x2c5   :  { %290 = dma.vmem_to_hbm [thread:$0]  %s288_s10, 128, %s550_s7, [#allocation4]  }
 0x2c6   :  { %442 = dma.done.wait [#allocation4], 128  }
 0x2c7   :  { %443 = vsyncadd [#allocation4], 4294967168 }
 0x2c8   :  { %294 = vsyncpa [#allocation3], 1 }
 0x2c9   :  { %295 = vsyncpa [#allocation6], 1 }
 0x2ca   :  { %296 = vsyncpa [#allocation4], 1 }

</bundles_post_ra>
